<compile_context>
chip_gen: v7x
topology: tpu7x:2x2x1
jax: 0.10.0
libtpu: 0.0.40
codegen_flags: <defaults>
</compile_context>

<pallas_src>
import functools

import jax
import jax.numpy as jnp
from jax.experimental import pallas as pl
from jax.experimental.pallas import tpu as pltpu


# --------------------------------------------------------------------------- #
# Kernels
# --------------------------------------------------------------------------- #
def _wnorm_kernel_sub(latent_ref, avg_ref, out_ref, *, batch, tb):
    """One grid step = TB batch rows.  Writes sum over rows of ||row - avg||_2
    (lane-broadcast) into this block's (1, 128) output slot."""
    b = pl.program_id(0)
    x = latent_ref[...].astype(jnp.float32)              # (TB, N*D)
    a = avg_ref[...]                                      # (1,  N*D) f32, broadcasts
    diff = x - a
    ssq = jnp.sum(diff * diff, axis=-1, keepdims=True)    # (TB, 1) per-row SSQ
    if batch % tb != 0:  # static: mask padded rows of the ragged last block (pre-sqrt)
        row_ids = jax.lax.broadcasted_iota(jnp.int32, (tb, 1), 0) + b * tb
        ssq = jnp.where(row_ids < batch, ssq, 0.0)
    norms = jnp.sqrt(ssq)                                  # (TB, 1)
    partial = jnp.sum(norms, axis=0, keepdims=True)        # (1, 1)
    out_ref[...] = jnp.broadcast_to(partial, out_ref.shape)


def _wnorm_kernel_nosub(latent_ref, out_ref, *, batch, tb):
    """Variant with no latent_avg subtraction."""
    b = pl.program_id(0)
    x = latent_ref[...].astype(jnp.float32)                # (TB, N*D)
    ssq = jnp.sum(x * x, axis=-1, keepdims=True)           # (TB, 1)
    if batch % tb != 0:
        row_ids = jax.lax.broadcasted_iota(jnp.int32, (tb, 1), 0) + b * tb
        ssq = jnp.where(row_ids < batch, ssq, 0.0)
    norms = jnp.sqrt(ssq)
    partial = jnp.sum(norms, axis=0, keepdims=True)
    out_ref[...] = jnp.broadcast_to(partial, out_ref.shape)


# --------------------------------------------------------------------------- #
# Generation-aware tiling helpers (all static / trace-time Python)
# --------------------------------------------------------------------------- #
def _device_kind():
    try:
        return jax.devices()[0].device_kind.lower()
    except Exception:  # pragma: no cover - no device info available
        return ""


def _default_block_target_bytes():
    """Per-generation latent-tile byte target (mem-bound kernel)."""
    kind = _device_kind()
    if "v7" in kind:
        return 6 * 1024 * 1024        # 3.2 TB/s HBM -> bigger tiles to amortize step cost
    if "v5 lite" in kind or "v5e" in kind or "lite" in kind:
        return 2 * 1024 * 1024        # 0.8 TB/s HBM: 1-2 MiB already at roofline
    return 4 * 1024 * 1024            # v6e / unknown


def _num_tensorcores():
    return 2 if "v7" in _device_kind() else 1


def _row_align(dtype):
    """Sublane packing of the rows dim: 8 for 32-bit, 16 for 16-bit, 32 for 8-bit."""
    itemsize = jnp.dtype(dtype).itemsize
    if itemsize >= 4:
        return 8
    if itemsize == 2:
        return 16
    return 32


def _choose_tb(batch, row_bytes, target_bytes, row_align, num_cores):
    """Rows per grid step: ~target_bytes per tile, sublane-aligned, and (on
    multi-TC chips) capped so the parallel grid axis has >= num_cores steps."""
    total_bytes = batch * row_bytes
    tb = max(1, target_bytes // max(1, row_bytes))
    if num_cores > 1 and total_bytes > target_bytes:
        tb = min(tb, max(1, -(-batch // num_cores)))  # ceil(B / num_cores)
    if tb >= batch:
        return batch                  # whole batch in one step; block == full dim
    tb = max(row_align, (tb // row_align) * row_align)
    return min(tb, batch)


# --------------------------------------------------------------------------- #
# Public entry point
# --------------------------------------------------------------------------- #
@functools.partial(
    jax.jit,
    static_argnames=("start_from_latent_avg", "block_target_bytes", "min_pallas_bytes"),
)
def w_norm_loss(latent, latent_avg=None, *, start_from_latent_avg=True,
                block_target_bytes=None, min_pallas_bytes=4 * 1024 * 1024):
    """latent: (B, N, D); latent_avg: (N, D) or None. Returns scalar f32 loss."""
    B, N, D = latent.shape
    nd = N * D
    itemsize = jnp.dtype(latent.dtype).itemsize
    total_bytes = B * nd * itemsize

    # Tiny inputs (typical W+ shapes): fused XLA elementwise+reduce beats a
    # standalone pallas_call's fixed dispatch/pipeline-fill cost.
    if total_bytes < min_pallas_bytes:
        return w_norm_loss_ref(latent, latent_avg,
                               start_from_latent_avg=start_from_latent_avg)

    lat2d = latent.reshape(B, nd)                         # flat, lane-aligned last dim

    target = (block_target_bytes if block_target_bytes is not None
              else _default_block_target_bytes())
    row_bytes = nd * itemsize
    tb = _choose_tb(B, row_bytes, target, _row_align(latent.dtype), _num_tensorcores())
    grid = pl.cdiv(B, tb)

    lat_spec = pl.BlockSpec((tb, nd), lambda b: (b, 0))
    out_spec = pl.BlockSpec((1, 128), lambda b: (b, 0))   # lane-dense per-block partial
    out_shape = jax.ShapeDtypeStruct((grid, 128), jnp.float32)

    if start_from_latent_avg:
        assert latent_avg is not None
        # Keep avg in f32: subtraction happens at promoted precision (matches ref).
        avg2d = latent_avg.reshape(1, nd).astype(jnp.float32)
        kernel = functools.partial(_wnorm_kernel_sub, batch=B, tb=tb)
        in_specs = [lat_spec, pl.BlockSpec((1, nd), lambda b: (0, 0))]
        args = (lat2d, avg2d)
        avg_bytes = nd * 4
    else:
        kernel = functools.partial(_wnorm_kernel_nosub, batch=B, tb=tb)
        in_specs = [lat_spec]
        args = (lat2d,)
        avg_bytes = 0

    # Scoped VMEM: 2x input tile (double buffering) + ~2x tile in f32 for the
    # cast/diff temporaries + avg + slack; capped well under v7x's 64 MiB physical.
    tile_bytes = tb * nd * itemsize
    f32_tile_bytes = tb * nd * 4
    vmem_limit = 2 * tile_bytes + 2 * f32_tile_bytes + 2 * avg_bytes + (2 << 20)
    vmem_limit = int(min(max(vmem_limit, 8 << 20), 64 << 20))

    partials = pl.pallas_call(
        kernel,
        out_shape=out_shape,
        grid_spec=pltpu.PrefetchScalarGridSpec(
            num_scalar_prefetch=0,
            grid=(grid,),
            in_specs=in_specs,
            out_specs=out_spec,
        ),
        compiler_params=pltpu.CompilerParams(
            dimension_semantics=("parallel",),   # independent partials -> both TCs on v7x
            vmem_limit_bytes=vmem_limit,
        ),
    )(*args)

    # Finalize in the surrounding XLA graph: sum partial norms, divide by batch.
    return jnp.sum(partials[:, 0]) / B


def w_norm_loss_ref(latent, latent_avg=None, *, start_from_latent_avg=True):
    """Pure-JAX reference mirroring the PyTorch module (also the small-input path)."""
    x = latent.astype(jnp.float32)
    if start_from_latent_avg:
        x = x - latent_avg.astype(jnp.float32)
    norms = jnp.sqrt(jnp.sum(x * x, axis=(1, 2)))
    return jnp.sum(norms) / latent.shape[0]


# --------------------------------------------------------------------------- #
# Demo / self-test
# --------------------------------------------------------------------------- #
if __name__ == "__main__":
    key = jax.random.PRNGKey(0)
    k1, k2, k3, k4 = jax.random.split(key, 4)

    # Small demo shape (batch, num style latents, latent dim).
    B, N, D = 2, 8, 512
    latent = jax.random.normal(k1, (B, N, D), dtype=jnp.float32)
    latent_avg = jax.random.normal(k2, (N, D), dtype=jnp.float32)

    # 1) Pallas path, with latent_avg subtraction (min_pallas_bytes=0 forces kernel).
    loss = jax.block_until_ready(
        w_norm_loss(latent, latent_avg, start_from_latent_avg=True, min_pallas_bytes=0))
    ref = w_norm_loss_ref(latent, latent_avg, start_from_latent_avg=True)
    assert jnp.allclose(loss, ref, rtol=1e-5, atol=1e-5), (loss, ref)

    # 2) Pallas path, without subtraction (separate kernel variant, no avg input).
    loss2 = jax.block_until_ready(
        w_norm_loss(latent, None, start_from_latent_avg=False, min_pallas_bytes=0))
    ref2 = w_norm_loss_ref(latent, None, start_from_latent_avg=False)
    assert jnp.allclose(loss2, ref2, rtol=1e-5, atol=1e-5), (loss2, ref2)

    # 3) Multi-block path with ragged last block (masking + grid > 1 + parallel axis).
    B3 = 20
    latent3 = jax.random.normal(k3, (B3, N, D), dtype=jnp.float32)
    loss3 = jax.block_until_ready(
        w_norm_loss(latent3, latent_avg, start_from_latent_avg=True,
                    block_target_bytes=64 * 1024, min_pallas_bytes=0))
    ref3 = w_norm_loss_ref(latent3, latent_avg, start_from_latent_avg=True)
    assert jnp.allclose(loss3, ref3, rtol=1e-5, atol=1e-5), (loss3, ref3)

    # 4) bf16 latents with f32 avg (mixed-precision promoted subtraction in-kernel).
    latent4 = jax.random.normal(k4, (B3, N, D), dtype=jnp.float32).astype(jnp.bfloat16)
    loss4 = jax.block_until_ready(
        w_norm_loss(latent4, latent_avg, start_from_latent_avg=True,
                    block_target_bytes=64 * 1024, min_pallas_bytes=0))
    ref4 = w_norm_loss_ref(latent4, latent_avg, start_from_latent_avg=True)
    assert jnp.allclose(loss4, ref4, rtol=2e-2, atol=2e-2), (loss4, ref4)

    # 5) Default small-input dispatch (pure-JAX fused path; semantics must match).
    loss5 = jax.block_until_ready(
        w_norm_loss(latent, latent_avg, start_from_latent_avg=True))
    assert jnp.allclose(loss5, ref, rtol=1e-5, atol=1e-5), (loss5, ref)

    print("KERNEL_OK")
</pallas_src>

<mosaic_0001>
module attributes {stable_mosaic.version = 11 : i64} {
  func.func @_wnorm_kernel_sub(%arg0: i32, %arg1: memref<2x4096xf32, #tpu.memory_space<vmem>>, %arg2: memref<1x4096xf32, #tpu.memory_space<vmem>>, %arg3: memref<1x128xf32, #tpu.memory_space<vmem>>) attributes {dimension_semantics = [#tpu.dimension_semantics<parallel>], iteration_bounds = array<i64: 1>, scalar_prefetch = 0 : i64, scratch_operands = 0 : i64, tpu.core_type = #tpu.core_type<tc>, window_params = [{transform_indices = @transform_0, window_bounds = array<i64: 2, 4096>}, {pipeline_mode = #tpu.pipeline_mode<synchronous>, transform_indices = @transform_1, window_bounds = array<i64: 1, 4096>}, {transform_indices = @transform_2, window_bounds = array<i64: 1, 128>}]} {
    %c0 = arith.constant 0 : index
    %c0_0 = arith.constant 0 : index
    %0 = vector.load %arg1[%c0, %c0_0] : memref<2x4096xf32, #tpu.memory_space<vmem>>, vector<2x4096xf32>
    %c0_1 = arith.constant 0 : index
    %c0_2 = arith.constant 0 : index
    %1 = vector.load %arg2[%c0_1, %c0_2] : memref<1x4096xf32, #tpu.memory_space<vmem>>, vector<1x4096xf32>
    %2 = vector.broadcast %1 : vector<1x4096xf32> to vector<2x4096xf32>
    %3 = arith.subf %0, %2 : vector<2x4096xf32>
    %4 = arith.mulf %3, %3 : vector<2x4096xf32>
    %cst = arith.constant dense<0.000000e+00> : vector<2xf32>
    %5 = vector.multi_reduction <add>, %4, %cst [1] : vector<2x4096xf32> to vector<2xf32>
    %6 = vector.shape_cast %5 : vector<2xf32> to vector<2x1xf32>
    %7 = math.sqrt %6 : vector<2x1xf32>
    %cst_3 = arith.constant dense<0.000000e+00> : vector<1xf32>
    %8 = vector.multi_reduction <add>, %7, %cst_3 [0] : vector<2x1xf32> to vector<1xf32>
    %9 = vector.shape_cast %8 : vector<1xf32> to vector<1x1xf32>
    %10 = vector.shape_cast %9 : vector<1x1xf32> to vector<1x1xf32>
    %11 = vector.broadcast %10 : vector<1x1xf32> to vector<1x128xf32>
    %c0_4 = arith.constant 0 : index
    %c0_5 = arith.constant 0 : index
    %12 = vector.load %arg3[%c0_4, %c0_5] : memref<1x128xf32, #tpu.memory_space<vmem>>, vector<1x128xf32>
    tpu.vector_store %arg3[%c0_4, %c0_5], %11 {strides = array<i32>} : memref<1x128xf32, #tpu.memory_space<vmem>>, vector<1x128xf32>,
    return
  }
  func.func @transform_0(%arg0: i32) -> (i32, i32) {
    %c0_i32 = arith.constant 0 : i32
    %c0_i32_0 = arith.constant 0 : i32
    return %arg0, %c0_i32 : i32, i32
  }
  func.func @transform_1(%arg0: i32) -> (i32, i32) {
    %c0_i32 = arith.constant 0 : i32
    %c0_i32_0 = arith.constant 0 : i32
    %c0_i32_1 = arith.constant 0 : i32
    return %c0_i32, %c0_i32_0 : i32, i32
  }
  func.func @transform_2(%arg0: i32) -> (i32, i32) {
    %c0_i32 = arith.constant 0 : i32
    %c0_i32_0 = arith.constant 0 : i32
    return %arg0, %c0_i32 : i32, i32
  }
}

</mosaic_0001>

<bundles_post_ra>
// kernel: w_norm_loss.1
= control target key start
LH: loop header
LB: loop body
LE: loop exit
PB: predicated region body
PF: predicated region fallthrough
CT: control target
= control target key end

     0   :  { %v27_v0 = vlaneseq  ;;  %v579_v2 = vmov 1983009808   ;;  %vm491_vm0 = vcmask 1041408   ;;  %s749_s1 = inlined_call_operand.vmem [shape: f32[1,4096], index: 1, kind: input, shape index: {}]   ;;  %s750_s0 = inlined_call_operand.vmem [shape: f32[2,4096], index: 0, kind: input, shape index: {}]   ;;  %s751_s2 = inlined_call_operand.vmem [shape: f32[1,128], index: 2, kind: output, shape index: {}]  }
   0x1   :  { %v158_v3 = vunpack.c.l.s4 %v579_v2  ;;  %v19_v8 = vld [vmem:[%s749_s1] sm:$0xff]  ;;  %v20_v25 = vld [vmem:[%s749_s1 + $0x8] sm:$0xff]  ;;  %v21_v53 = vld [vmem:[%s749_s1 + $0x10] sm:$0xff] }
   0x2   :  { %v28_v1 = vshrl.u32 %v27_v0, 7  ;;  %v11_v31 = vld [vmem:[%s750_s0] sm:$0xff]  ;;  %v12_v42 = vld [vmem:[%s750_s0 + $0x8] sm:$0xff]  ;;  %v13_v59 = vld [vmem:[%s750_s0 + $0x10] sm:$0xff] }
   0x3   :  { %v159_v13 = vunpack.c.0.s8 %v158_v3 }
   0x4   :  { %v595_v4 = vsub.s32 0, %v28_v1  ;;  %v597_v5 = vsub.s32 1, %v28_v1  ;;  %v599_v6 = vsub.s32 2, %v28_v1  ;;  %v601_v7 = vsub.s32 3, %v28_v1 }
   0x5   :  { %v606_v9 = vsub.s32 4, %v28_v1  ;;  %v608_v10 = vsub.s32 5, %v28_v1  ;;  %v610_v11 = vsub.s32 6, %v28_v1  ;;  %v612_v12 = vsub.s32 7, %v28_v1 }
   0x6   :  { %v30_v14 = vrot.slane %v19_v8, %v595_v4  ;;  %v34_v15 = vrot.slane %v19_v8, %v597_v5  ;;  %v38_v16 = vrot.slane %v19_v8, %v599_v6  ;;  %v42_v17 = vrot.slane %v19_v8, %v601_v7 }
   0x7   :  { %v46_v18 = vrot.slane %v19_v8, %v606_v9  ;;  %v50_v19 = vrot.slane %v19_v8, %v608_v10  ;;  %v54_v20 = vrot.slane %v19_v8, %v610_v11  ;;  %v58_v21 = vrot.slane %v19_v8, %v612_v12 }
   0x8   :  { %v155_v22 = vcombine.low %v30_v14, %v34_v15  ;;  %v156_v23 = vcombine.low %v38_v16, %v42_v17  ;;  %v622_v24 = vsub.s32 %v159_v13, %v28_v1  ;;  %v62_v32 = vrot.slane %v20_v25, %v595_v4 }
   0x9   :  { %v172_v28 = vcombine.low %v46_v18, %v50_v19  ;;  %v173_v29 = vcombine.low %v54_v20, %v58_v21  ;;  %v66_v33 = vrot.slane %v20_v25, %v597_v5  ;;  %v70_v34 = vrot.slane %v20_v25, %v599_v6 }
   0xa   :  { %v163_v26 = vrot.slane %v155_v22, %v622_v24  ;;  %v170_v27 = vrot.slane %v156_v23, %v622_v24  ;;  %v74_v35 = vrot.slane %v20_v25, %v601_v7  ;;  %v78_v44 = vrot.slane %v20_v25, %v606_v9  ;;  %v14_v22 = vld [vmem:[%s750_s0 + $0x18] sm:$0xff] }
   0xb   :  { %v180_v36 = vrot.slane %v172_v28, %v622_v24  ;;  %v187_v37 = vrot.slane %v173_v29, %v622_v24  ;;  %v189_v40 = vcombine.low %v62_v32, %v66_v33  ;;  %v82_v45 = vrot.slane %v20_v25, %v608_v10 }
   0xc   :  { %v171_v30 = vcombine.low %v163_v26, %v170_v27  ;;  %v190_v41 = vcombine.low %v70_v34, %v74_v35  ;;  %v86_v46 = vrot.slane %v20_v25, %v610_v11  ;;  %v90_v47 = vrot.slane %v20_v25, %v612_v12 }
   0xd   :  { %v188_v39 = vcombine.low %v180_v36, %v187_v37  ;;  %v197_v48 = vrot.slane %v189_v40, %v622_v24  ;;  %v206_v54 = vcombine.low %v78_v44, %v82_v45  ;;  %v94_v60 = vrot.slane %v21_v53, %v595_v4 }
   0xe   :  { %v299_v38 = vsub.f32 %v11_v31, %v171_v30  ;;  %v204_v49 = vrot.slane %v190_v41, %v622_v24  ;;  %v207_v55 = vcombine.low %v86_v46, %v90_v47  ;;  %v98_v61 = vrot.slane %v21_v53, %v597_v5 }
   0xf   :  { %v300_v50 = vsub.f32 %v12_v42, %v188_v39  ;;  %v102_v63 = vrot.slane %v21_v53, %v599_v6  ;;  %v106_v0 = vrot.slane %v21_v53, %v601_v7  ;;  %v214_v1 = vrot.slane %v206_v54, %v622_v24 }
  0x10   :  { %v307_v43 = vmul.f32 %v299_v38, %v299_v38  ;;  %v205_v56 = vcombine.low %v197_v48, %v204_v49  ;;  %v221_v2 = vrot.slane %v207_v55, %v622_v24  ;;  %v223_v19 = vcombine.low %v94_v60, %v98_v61  ;;  %v15_v49 = vld [vmem:[%s750_s0 + $0x20] sm:$0xff] }
  0x11   :  { %v308_v57 = vmul.f32 %v300_v50, %v300_v50  ;;  %v224_v20 = vcombine.low %v102_v63, %v106_v0  ;;  %v110_v28 = vrot.slane %v21_v53, %v606_v9  ;;  %v114_v30 = vrot.slane %v21_v53, %v608_v10 }
  0x12   :  { %v323_v51 = vcombine.high %v307_v43, %v307_v43  ;;  %v330_v52 = vrot.slane %v307_v43, %v622_v24  ;;  %v301_v3 = vsub.f32 %v13_v59, %v205_v56  ;;  %v222_v18 = vcombine.low %v214_v1, %v221_v2  ;;  %v22_v43 = vld [vmem:[%s749_s1 + $0x18] sm:$0xff] }
  0x13   :  { %v340_v13 = vcombine.high %v308_v57, %v308_v57  ;;  %v347_v14 = vrot.slane %v308_v57, %v622_v24  ;;  %v118_v31 = vrot.slane %v21_v53, %v610_v11  ;;  %v122_v32 = vrot.slane %v21_v53, %v612_v12 }
  0x14   :  { %v337_v58 = vrot.slane %v323_v51, %v622_v24  ;;  %v338_v62 = vcombine.high %v330_v52, %v330_v52  ;;  %v492_v15 = vsel %vm491_vm0, %v330_v52, 0.0  ;;  %v309_v23 = vmul.f32 %v301_v3, %v301_v3 }
  0x15   :  { %v354_v25 = vrot.slane %v340_v13, %v622_v24  ;;  %v355_v26 = vcombine.high %v347_v14, %v347_v14  ;;  %v499_v33 = vsel %vm491_vm0, %v347_v14, 0.0  ;;  %v231_v34 = vrot.slane %v223_v19, %v622_v24  ;;  %v16_v14 = vld [vmem:[%s750_s0 + $0x28] sm:$0xff] }
  0x16   :  { %v339_v8 = vcombine.high %v337_v58, %v337_v58  ;;  %v493_v16 = vsel %vm491_vm0, %v338_v62, 0.0  ;;  %v495_v17 = vsel %vm491_vm0, %v337_v58, 0.0  ;;  %v238_v35 = vrot.slane %v224_v20, %v622_v24 }
  0x17   :  { %v494_v21 = vadd.f32 %v493_v16, %v492_v15  ;;  %v302_v36 = vsub.f32 %v14_v22, %v222_v18  ;;  %v356_v38 = vcombine.high %v354_v25, %v354_v25  ;;  %v357_v39 = vcombine.high %v309_v23, %v309_v23 }
  0x18   :  { %v497_v27 = vsel %vm491_vm0, %v339_v8, 0.0  ;;  %v364_v40 = vrot.slane %v309_v23, %v622_v24  ;;  %v501_v41 = vsel %vm491_vm0, %v355_v26, 0.0  ;;  %v503_v44 = vsel %vm491_vm0, %v354_v25, 0.0 }
  0x19   :  { %v496_v29 = vadd.f32 %v495_v17, %v494_v21  ;;  %v239_v45 = vcombine.low %v231_v34, %v238_v35  ;;  %v240_v46 = vcombine.low %v110_v28, %v114_v30  ;;  %v241_v47 = vcombine.low %v118_v31, %v122_v32 }
  0x1a   :  { %v310_v50 = vmul.f32 %v302_v36, %v302_v36  ;;  %v371_v51 = vrot.slane %v357_v39, %v622_v24  ;;  %v372_v52 = vcombine.high %v364_v40, %v364_v40  ;;  %v505_v53 = vsel %vm491_vm0, %v356_v38, 0.0  ;;  %v17_v36 = vld [vmem:[%s750_s0 + $0x30] sm:$0xff] }
  0x1b   :  { %v498_v37 = vadd.f32 %v497_v27, %v496_v29  ;;  %v126_v54 = vrot.slane %v22_v43, %v595_v4  ;;  %v130_v56 = vrot.slane %v22_v43, %v597_v5  ;;  %v134_v57 = vrot.slane %v22_v43, %v599_v6 }
  0x1c   :  { %v138_v58 = vrot.slane %v22_v43, %v601_v7  ;;  %v507_v59 = vsel %vm491_vm0, %v364_v40, 0.0  ;;  %v248_v60 = vrot.slane %v240_v46, %v622_v24  ;;  %v255_v61 = vrot.slane %v241_v47, %v622_v24 }
  0x1d   :  { %v500_v42 = vadd.f32 %v499_v33, %v498_v37  ;;  %v303_v62 = vsub.f32 %v15_v49, %v239_v45  ;;  %v373_v0 = vcombine.high %v371_v51, %v371_v51  ;;  %v374_v1 = vcombine.high %v310_v50, %v310_v50 }
  0x1e   :  { %v381_v2 = vrot.slane %v310_v50, %v622_v24  ;;  %v509_v4 = vsel %vm491_vm0, %v372_v52, 0.0  ;;  %v511_v5 = vsel %vm491_vm0, %v371_v51, 0.0  ;;  %v256_v6 = vcombine.low %v248_v60, %v255_v61 }
  0x1f   :  { %v502_v48 = vadd.f32 %v501_v41, %v500_v42  ;;  %v257_v8 = vcombine.low %v126_v54, %v130_v56  ;;  %v258_v7 = vcombine.low %v134_v57, %v138_v58  ;;  %v311_v15 = vmul.f32 %v303_v62, %v303_v62 }
  0x20   :  { %v388_v16 = vrot.slane %v374_v1, %v622_v24  ;;  %v389_v17 = vcombine.high %v381_v2, %v381_v2  ;;  %v513_v18 = vsel %vm491_vm0, %v373_v0, 0.0  ;;  %v142_v19 = vrot.slane %v22_v43, %v606_v9 }
  0x21   :  { %v504_v55 = vadd.f32 %v503_v44, %v502_v48  ;;  %v146_v21 = vrot.slane %v22_v43, %v608_v10  ;;  %v150_v22 = vrot.slane %v22_v43, %v610_v11  ;;  %v154_v23 = vrot.slane %v22_v43, %v612_v12 }
  0x22   :  { %v515_v25 = vsel %vm491_vm0, %v381_v2, 0.0  ;;  %v265_v26 = vrot.slane %v257_v8, %v622_v24  ;;  %v272_v27 = vrot.slane %v258_v7, %v622_v24  ;;  %v304_v28 = vsub.f32 %v16_v14, %v256_v6 }
  0x23   :  { %v506_v63 = vadd.f32 %v505_v53, %v504_v55  ;;  %v390_v30 = vcombine.high %v388_v16, %v388_v16  ;;  %v391_v31 = vcombine.high %v311_v15, %v311_v15  ;;  %v398_v32 = vrot.slane %v311_v15, %v622_v24  ;;  %v18_v55 = vld [vmem:[%s750_s0 + $0x38] sm:$0xff] }
  0x24   :  { %v517_v9 = vsel %vm491_vm0, %v389_v17, 0.0  ;;  %v519_v10 = vsel %vm491_vm0, %v388_v16, 0.0  ;;  %v273_v11 = vcombine.low %v265_v26, %v272_v27  ;;  %v274_v34 = vcombine.low %v142_v19, %v146_v21 }
  0x25   :  { %v508_v3 = vadd.f32 %v507_v59, %v506_v63  ;;  %v275_v12 = vcombine.low %v150_v22, %v154_v23  ;;  %v312_v37 = vmul.f32 %v304_v28, %v304_v28  ;;  %v405_v38 = vrot.slane %v391_v31, %v622_v24 }
  0x26   :  { %v406_v39 = vcombine.high %v398_v32, %v398_v32  ;;  %v521_v40 = vsel %vm491_vm0, %v390_v30, 0.0  ;;  %v523_v42 = vsel %vm491_vm0, %v398_v32, 0.0  ;;  %v282_v43 = vrot.slane %v274_v34, %v622_v24 }
  0x27   :  { %v510_v13 = vadd.f32 %v509_v4, %v508_v3  ;;  %v289_v44 = vrot.slane %v275_v12, %v622_v24  ;;  %v305_v45 = vsub.f32 %v17_v36, %v273_v11  ;;  %v407_v47 = vcombine.high %v405_v38, %v405_v38 }
  0x28   :  { %v408_v48 = vcombine.high %v312_v37, %v312_v37  ;;  %v415_v49 = vrot.slane %v312_v37, %v622_v24  ;;  %v525_v50 = vsel %vm491_vm0, %v406_v39, 0.0  ;;  %v527_v52 = vsel %vm491_vm0, %v405_v38, 0.0 }
  0x29   :  { %v512_v20 = vadd.f32 %v511_v5, %v510_v13  ;;  %v290_v53 = vcombine.low %v282_v43, %v289_v44  ;;  %v313_v56 = vmul.f32 %v305_v45, %v305_v45  ;;  %v529_v59 = vsel %vm491_vm0, %v407_v47, 0.0 }
  0x2a   :  { %v422_v57 = vrot.slane %v408_v48, %v622_v24  ;;  %v423_v58 = vcombine.high %v415_v49, %v415_v49  ;;  %v531_v61 = vsel %vm491_vm0, %v415_v49, 0.0 }
  0x2b   :  { %v514_v29 = vadd.f32 %v513_v18, %v512_v20  ;;  %v306_v62 = vsub.f32 %v18_v55, %v290_v53  ;;  %v425_v1 = vcombine.high %v313_v56, %v313_v56  ;;  %v432_v2 = vrot.slane %v313_v56, %v622_v24 }
  0x2c   :  { %v424_v0 = vcombine.high %v422_v57, %v422_v57  ;;  %v533_v4 = vsel %vm491_vm0, %v423_v58, 0.0  ;;  %v535_v5 = vsel %vm491_vm0, %v422_v57, 0.0 }
  0x2d   :  { %v516_v33 = vadd.f32 %v515_v25, %v514_v29  ;;  %v314_v8 = vmul.f32 %v306_v62, %v306_v62  ;;  %v439_v7 = vrot.slane %v425_v1, %v622_v24  ;;  %v440_v13 = vcombine.high %v432_v2, %v432_v2 }
  0x2e   :  { %v537_v14 = vsel %vm491_vm0, %v424_v0, 0.0  ;;  %v539_v16 = vsel %vm491_vm0, %v432_v2, 0.0 }
  0x2f   :  { %v518_v35 = vadd.f32 %v517_v9, %v516_v33  ;;  %v441_v18 = vcombine.high %v439_v7, %v439_v7  ;;  %v442_v19 = vcombine.high %v314_v8, %v314_v8  ;;  %v449_v20 = vrot.slane %v314_v8, %v622_v24 }
  0x30   :  { %v541_v21 = vsel %vm491_vm0, %v440_v13, 0.0  ;;  %v543_v23 = vsel %vm491_vm0, %v439_v7, 0.0 }
  0x31   :  { %v520_v41 = vadd.f32 %v519_v10, %v518_v35  ;;  %v456_v26 = vrot.slane %v442_v19, %v622_v24  ;;  %v457_v27 = vcombine.high %v449_v20, %v449_v20  ;;  %v545_v28 = vsel %vm491_vm0, %v441_v18, 0.0 }
  0x32   :  { %v547_v30 = vsel %vm491_vm0, %v449_v20, 0.0 }
  0x33   :  { %v522_v46 = vadd.f32 %v521_v40, %v520_v41  ;;  %v458_v32 = vcombine.high %v456_v26, %v456_v26  ;;  %v549_v9 = vsel %vm491_vm0, %v457_v27, 0.0  ;;  %v551_v10 = vsel %vm491_vm0, %v456_v26, 0.0 }
  0x35   :  { %v524_v51 = vadd.f32 %v523_v42, %v522_v46  ;;  %v553_v34 = vsel %vm491_vm0, %v458_v32, 0.0 }
  0x37   :  { %v526_v54 = vadd.f32 %v525_v50, %v524_v51 }
  0x39   :  { %v528_v60 = vadd.f32 %v527_v52, %v526_v54 }
  0x3b   :  { %v530_v63 = vadd.f32 %v529_v59, %v528_v60 }
  0x3d   :  { %v532_v3 = vadd.f32 %v531_v61, %v530_v63 }
  0x3f   :  { %v534_v6 = vadd.f32 %v533_v4, %v532_v3 }
  0x41   :  { %v536_v15 = vadd.f32 %v535_v5, %v534_v6 }
  0x43   :  { %v538_v17 = vadd.f32 %v537_v14, %v536_v15 }
  0x45   :  { %v540_v22 = vadd.f32 %v539_v16, %v538_v17 }
  0x47   :  { %v542_v25 = vadd.f32 %v541_v21, %v540_v22 }
  0x49   :  { %v544_v29 = vadd.f32 %v543_v23, %v542_v25 }
  0x4b   :  { %v546_v31 = vadd.f32 %v545_v28, %v544_v29 }
  0x4d   :  { %v548_v33 = vadd.f32 %v547_v30, %v546_v31 }
  0x4f   :  { %v550_v11 = vadd.f32 %v549_v9, %v548_v33 }
  0x51   :  { %v552_v12 = vadd.f32 %v551_v10, %v550_v11 }
  0x53   :  { %v554_v35 = vadd.f32 %v553_v34, %v552_v12 }
  0x55   :  { %555 = vadd.xlane.f32.xlu0 %v554_v35 }
  0xe2   :  { %v556_v24 = vpop.xlane.xlu0 %555 }
  0xe3   :  { %577 = vrsqrt.f32 %v556_v24  ;;  %vm559_vm1 = vcmp.eq.f32.partialorder %v556_v24, inf  ;;  %v562_v38 = vand.u32 2147483648, %v556_v24  ;;  %vm561_vm2 = vcmp.eq.f32.partialorder %v556_v24, 0.0 }
  0xed   :  { %v578_v36 = vpop.eup %577 }
  0xee   :  { %v558_v37 = vmul.f32 %v578_v36, %v556_v24 }
  0xf0   :  { %v560_v39 = vsel %vm559_vm1, %v556_v24, %v558_v37 }
  0xf1   :  { %v563_v40 = vsel %vm561_vm2, %v562_v38, %v560_v39 }
  0xf2   :  { %v564_v41 = vsel %vm491_vm0, %v563_v40, 0.0 }
  0xf3   :  { %v565_v42 = vrot.slane %v564_v41, 4 }
  0xf5   :  { %v566_v43 = vadd.f32 %v565_v42, %v564_v41 }
  0xf7   :  { %v567_v44 = vrot.slane %v566_v43, 2 }
  0xf9   :  { %v568_v45 = vadd.f32 %v567_v44, %v566_v43 }
  0xfb   :  { %v569_v46 = vrot.slane %v568_v45, 1 }
  0xfd   :  { %v570_v47 = vadd.f32 %v569_v46, %v568_v45 }
  0xff   :  { %571 = vst [vmem:[%s751_s2] sm:$0x1] %v570_v47 }

</bundles_post_ra>
